<compile_context>
chip_gen: v5e
topology: v5e:2x2
jax: 0.10.0
libtpu: 0.0.40
codegen_flags: <defaults>
</compile_context>

<pallas_src>
import math

import jax
import jax.numpy as jnp
from jax.experimental import pallas as pl
from jax.experimental.pallas import tpu as pltpu


def _round_up(x, m):
    return (x + m - 1) // m * m


# ---------------------------------------------------------------------------
# Stage 1: support = x @ (weight + weight_delta)   -> [N, F_out_pad] (bf16)
# ---------------------------------------------------------------------------
def _support_kernel(x_ref, w_ref, wd_ref, sup_ref):
    # Keep the parameter add in f32 on the VPU (v5e has no bf16 VPU path);
    # cast only the MXU operands to bf16, accumulate in f32.
    w_eff = w_ref[...] + wd_ref[...]
    sup = jnp.dot(
        x_ref[...].astype(jnp.bfloat16),
        w_eff.astype(jnp.bfloat16),
        preferred_element_type=jnp.float32,
    )
    sup_ref[...] = sup.astype(sup_ref.dtype)


def _compute_support(x, w_pad, wd_pad, *, tm):
    n, f_in = x.shape
    f_out_pad = w_pad.shape[1]
    return pl.pallas_call(
        _support_kernel,
        out_shape=jax.ShapeDtypeStruct((n, f_out_pad), jnp.bfloat16),
        grid_spec=pltpu.PrefetchScalarGridSpec(
            num_scalar_prefetch=0,
            grid=(n // tm,),
            in_specs=[
                pl.BlockSpec((tm, f_in), lambda i: (i, 0)),         # x row tile
                pl.BlockSpec((f_in, f_out_pad), lambda i: (0, 0)),  # weight
                pl.BlockSpec((f_in, f_out_pad), lambda i: (0, 0)),  # weight_delta
            ],
            out_specs=pl.BlockSpec((tm, f_out_pad), lambda i: (i, 0)),
        ),
        compiler_params=pltpu.CompilerParams(
            dimension_semantics=("parallel",),
            vmem_limit_bytes=32 * 1024 * 1024,
        ),
    )(x, w_pad, wd_pad)


# ---------------------------------------------------------------------------
# Stage 2: output = adj @ support + bias           -> [N, F_out_pad] (f32)
# ---------------------------------------------------------------------------
def _aggregate_kernel(adj_ref, sup_ref, bias_ref, out_ref, acc_ref):
    k = pl.program_id(1)

    @pl.when(k == 0)
    def _():
        acc_ref[...] = jnp.zeros_like(acc_ref)

    # bf16 x bf16 -> f32 accumulation on the MXU.
    acc_ref[...] += jnp.dot(
        adj_ref[...], sup_ref[...], preferred_element_type=jnp.float32
    )

    @pl.when(k == pl.num_programs(1) - 1)
    def _():
        out_ref[...] = (acc_ref[...] + bias_ref[...]).astype(out_ref.dtype)


def _aggregate(adj_bf16, support, bias_pad, out_dtype, *, tm, tk):
    n = adj_bf16.shape[0]
    f_out_pad = support.shape[1]
    return pl.pallas_call(
        _aggregate_kernel,
        out_shape=jax.ShapeDtypeStruct((n, f_out_pad), out_dtype),
        grid_spec=pltpu.PrefetchScalarGridSpec(
            num_scalar_prefetch=0,
            grid=(n // tm, n // tk),
            in_specs=[
                pl.BlockSpec((tm, tk), lambda i, k: (i, k)),          # adj tile
                pl.BlockSpec((tk, f_out_pad), lambda i, k: (k, 0)),   # support slab
                pl.BlockSpec((1, f_out_pad), lambda i, k: (0, 0)),    # bias
            ],
            out_specs=pl.BlockSpec((tm, f_out_pad), lambda i, k: (i, 0)),
            scratch_shapes=[pltpu.VMEM((tm, f_out_pad), jnp.float32)],
        ),
        compiler_params=pltpu.CompilerParams(
            # Row tiles are independent -> parallel (megacore sharding on v7x);
            # the contraction axis carries the accumulator -> arbitrary (last).
            dimension_semantics=("parallel", "arbitrary"),
            vmem_limit_bytes=32 * 1024 * 1024,
        ),
    )(adj_bf16, support, bias_pad)


def gcn_forward(x, adj, weight, weight_delta, bias, *, tm=256, tk=512):
    """Pallas GraphConvolution forward. x:[N,F_in], adj:[N,N] -> [N,F_out]."""
    n, f_in = x.shape
    f_out = weight.shape[1]

    # Lane-dense kernel outputs: pad the feature axis up to a multiple of 128.
    f_out_pad = _round_up(f_out, 128)
    pad = f_out_pad - f_out
    w_pad = jnp.pad(weight, ((0, 0), (0, pad)))
    wd_pad = jnp.pad(weight_delta, ((0, 0), (0, pad)))
    if bias is None:
        bias = jnp.zeros((f_out,), x.dtype)
    bias_pad = jnp.pad(bias, (0, pad)).reshape(1, f_out_pad).astype(jnp.float32)

    # Clamp tiles to the problem size (collapses the grid at small N).
    tm = min(tm, n)
    tk = min(tk, n)
    assert n % tm == 0 and n % tk == 0, "N must divide the row / contraction tiles"

    # Stage 1: support in bf16 (halves its HBM/VMEM traffic for stage 2).
    support = _compute_support(x, w_pad, wd_pad, tm=tm)

    # Stage 2: adj streamed as bf16 (adj is the N^2 array dominating bytes).
    adj_bf16 = adj.astype(jnp.bfloat16)
    out = _aggregate(adj_bf16, support, bias_pad, x.dtype, tm=tm, tk=tk)

    if pad:
        out = out[:, :f_out]
    return out


if __name__ == "__main__":
    # Small, TPU-friendly shapes: N nodes, in_features, out_features.
    N, F_IN, F_OUT = 256, 128, 64
    key = jax.random.PRNGKey(0)
    k_x, k_adj, k_w, k_b = jax.random.split(key, 4)

    # Node features.
    x = jax.random.normal(k_x, (N, F_IN), dtype=jnp.float32)

    # Dense "normalized adjacency": random sparse-ish symmetric + self loops,
    # row-normalized.
    a = (jax.random.uniform(k_adj, (N, N)) < 0.05).astype(jnp.float32)
    a = jnp.maximum(a, a.T) + jnp.eye(N, dtype=jnp.float32)
    adj = a / jnp.sum(a, axis=1, keepdims=True)

    # Parameter init matching reset_parameters(): uniform(-stdv, stdv),
    # stdv = 1/sqrt(out_features); weight_delta zeroed.
    stdv = 1.0 / math.sqrt(F_OUT)
    weight = jax.random.uniform(
        k_w, (F_IN, F_OUT), minval=-stdv, maxval=stdv, dtype=jnp.float32
    )
    weight_delta = jnp.zeros((F_IN, F_OUT), dtype=jnp.float32)
    bias = jax.random.uniform(
        k_b, (F_OUT,), minval=-stdv, maxval=stdv, dtype=jnp.float32
    )

    out = gcn_forward(x, adj, weight, weight_delta, bias)
    out = jax.block_until_ready(out)

    # Reference (plain JAX, f32) check. bf16 MXU operands with f32 accumulation
    # -> tolerance loosened accordingly.
    ref = adj @ (x @ (weight + weight_delta)) + bias
    assert out.shape == (N, F_OUT)
    assert jnp.allclose(out, ref, atol=3e-2, rtol=3e-2), "mismatch vs reference"

    print("KERNEL_OK")
</pallas_src>

<mosaic_0001>
module attributes {stable_mosaic.version = 11 : i64} {
  func.func @_support_kernel(%arg0: i32, %arg1: memref<256x128xf32, #tpu.memory_space<vmem>>, %arg2: memref<128x128xf32, #tpu.memory_space<vmem>>, %arg3: memref<128x128xf32, #tpu.memory_space<vmem>>, %arg4: memref<256x128xbf16, #tpu.memory_space<vmem>>) attributes {dimension_semantics = [#tpu.dimension_semantics<parallel>], iteration_bounds = array<i64: 1>, scalar_prefetch = 0 : i64, scratch_operands = 0 : i64, tpu.core_type = #tpu.core_type<tc>, window_params = [{transform_indices = @transform_0, window_bounds = array<i64: 256, 128>}, {pipeline_mode = #tpu.pipeline_mode<synchronous>, transform_indices = @transform_1, window_bounds = array<i64: 128, 128>}, {pipeline_mode = #tpu.pipeline_mode<synchronous>, transform_indices = @transform_2, window_bounds = array<i64: 128, 128>}, {transform_indices = @transform_3, window_bounds = array<i64: 256, 128>}]} {
    %c0 = arith.constant 0 : index
    %c0_0 = arith.constant 0 : index
    %0 = vector.load %arg2[%c0, %c0_0] : memref<128x128xf32, #tpu.memory_space<vmem>>, vector<128x128xf32>
    %c0_1 = arith.constant 0 : index
    %c0_2 = arith.constant 0 : index
    %1 = vector.load %arg3[%c0_1, %c0_2] : memref<128x128xf32, #tpu.memory_space<vmem>>, vector<128x128xf32>
    %2 = arith.addf %0, %1 : vector<128x128xf32>
    %c0_3 = arith.constant 0 : index
    %c0_4 = arith.constant 0 : index
    %3 = vector.load %arg1[%c0_3, %c0_4] : memref<256x128xf32, #tpu.memory_space<vmem>>, vector<256x128xf32>
    %4 = arith.truncf %3 : vector<256x128xf32> to vector<256x128xbf16>
    %5 = arith.truncf %2 : vector<128x128xf32> to vector<128x128xbf16>
    %cst = arith.constant dense<0.000000e+00> : vector<256x128xf32>
    %6 = tpu.matmul %4, %5, %cst {dimension_numbers = #tpu.dot_dimension_numbers<[1], [0], [0], [1], [0, 0, 1, 1], [], []>} : vector<256x128xbf16>, vector<128x128xbf16>, vector<256x128xf32> -> vector<256x128xf32>
    %7 = arith.truncf %6 : vector<256x128xf32> to vector<256x128xbf16>
    %c0_5 = arith.constant 0 : index
    %c0_6 = arith.constant 0 : index
    %8 = vector.load %arg4[%c0_5, %c0_6] : memref<256x128xbf16, #tpu.memory_space<vmem>>, vector<256x128xbf16>
    tpu.vector_store %arg4[%c0_5, %c0_6], %7 {strides = array<i32>} : memref<256x128xbf16, #tpu.memory_space<vmem>>, vector<256x128xbf16>,
    return
  }
  func.func @transform_0(%arg0: i32) -> (i32, i32) {
    %c0_i32 = arith.constant 0 : i32
    %c0_i32_0 = arith.constant 0 : i32
    return %arg0, %c0_i32 : i32, i32
  }
  func.func @transform_1(%arg0: i32) -> (i32, i32) {
    %c0_i32 = arith.constant 0 : i32
    %c0_i32_0 = arith.constant 0 : i32
    %c0_i32_1 = arith.constant 0 : i32
    return %c0_i32, %c0_i32_0 : i32, i32
  }
  func.func @transform_2(%arg0: i32) -> (i32, i32) {
    %c0_i32 = arith.constant 0 : i32
    %c0_i32_0 = arith.constant 0 : i32
    %c0_i32_1 = arith.constant 0 : i32
    return %c0_i32, %c0_i32_0 : i32, i32
  }
  func.func @transform_3(%arg0: i32) -> (i32, i32) {
    %c0_i32 = arith.constant 0 : i32
    %c0_i32_0 = arith.constant 0 : i32
    return %arg0, %c0_i32 : i32, i32
  }
}

</mosaic_0001>

<bundles_post_ra>
// kernel: tpu_custom_call.1
= control target key start
LH: loop header
LB: loop body
LE: loop exit
PB: predicated region body
PF: predicated region fallthrough
CT: control target
= control target key end

     0   :  { %8 = vsyncpa [#allocation3], 0  ;;  %s608_s0 = inlined_call_operand.hbm [shape: f32[256,128], index: 0, kind: input, shape index: {}]   ;;  %s609_s1 = inlined_call_operand.hbm [shape: f32[128,128], index: 1, kind: input, shape index: {}]   ;;  %s610_s2 = inlined_call_operand.hbm [shape: f32[128,128], index: 2, kind: input, shape index: {}]   ;;  %s611_s3 = inlined_call_operand.hbm [shape: bf16[256,128], index: 3, kind: output, shape index: {}]  }
   0x1   :  { %9 = vsyncpa [#allocation6], 0 }
   0x2   :  { %10 = vsyncpa [#allocation4], 0  ;;  %s28_s14 = sshll.u32 %s609_s1, 4  ;;  %s568_s15 = smov [#allocation5]   ;;  %s29_s14 = int_to_ptr.hbm [resolvable:$true] %s28_s14 }
   0x3   :  { %s30_s16 = sshll.u32 %s568_s15, 4  ;;  %s15_s19 = sshll.u32 %s608_s0, 4  ;;  %s31_s16 = int_to_ptr.vmem [resolvable:$true] %s30_s16  ;;  %s16_s19 = int_to_ptr.hbm [resolvable:$true] %s15_s19 }
   0x4   :  { %s569_s20 = smov 128   ;;  %s570_s21 = smov 8  }
   0x5   :  { %36 = dma.hbm_to_vmem [thread:$0]  %s29_s14, 2048, %s31_s16, [#allocation6], %s569_s20, %s569_s20, %s570_s21  }
   0x6   :  { %s571_s22 = smov [#allocation2]   ;;  %s41_s26 = sshll.u32 %s610_s2, 4  ;;  %s42_s26 = int_to_ptr.hbm [resolvable:$true] %s41_s26 }
   0x7   :  { %s17_s23 = sshll.u32 %s571_s22, 4  ;;  %s572_s1 = smov [#allocation7]   ;;  %s18_s23 = int_to_ptr.vmem [resolvable:$true] %s17_s23 }
   0x8   :  { %23 = dma.hbm_to_vmem [thread:$0]  %s16_s19, 4096, %s18_s23, [#allocation3], %s569_s20, %s569_s20, %s570_s21  }
   0x9   :  { %s43_s27 = sshll.u32 %s572_s1, 4  ;;  %s44_s27 = int_to_ptr.vmem [resolvable:$true] %s43_s27 }
   0xa   :  { %49 = dma.hbm_to_vmem [thread:$0]  %s42_s26, 2048, %s44_s27, [#allocation6], %s569_s20, %s569_s20, %s570_s21  }
   0xb   :  { %562 = dma.done.wait [#allocation3], 4096  }
   0xc   :  { %563 = vsyncadd [#allocation3], 4294963200 }
   0xd   :  { %564 = dma.done.wait [#allocation6], 4096  }
   0xe   :  { %565 = vsyncadd [#allocation6], 4294963200  ;;  %v76_v0 = vld [vmem:[#allocation5 + $0x70] sm:$0xff]  ;;  %v77_v1 = vld [vmem:[#allocation5 + $0x78] sm:$0xff]  ;;  %s573_s0 = smov [#allocation8]   ;;  %s325_s30 = sshll.u32 %s611_s3, 4  ;;  %s326_s30 = int_to_ptr.hbm [resolvable:$true] %s325_s30 }
   0xf   :  { %v92_v2 = vld [vmem:[#allocation7 + $0x70] sm:$0xff]  ;;  %v93_v3 = vld [vmem:[#allocation7 + $0x78] sm:$0xff]  ;;  %v74_v5 = vld [vmem:[#allocation5 + $0x60] sm:$0xff]  ;;  %s323_s2 = sshll.u32 %s573_s0, 4  ;;  %s574_s4 = smov 64   ;;  %s324_s2 = int_to_ptr.vmem [resolvable:$true] %s323_s2 }
  0x10   :  { %v108_v4 = vadd.f32 %v92_v2, %v76_v0  ;;  %v75_v6 = vld [vmem:[#allocation5 + $0x68] sm:$0xff]  ;;  %v109_v7 = vadd.f32 %v93_v3, %v77_v1  ;;  %v90_v8 = vld [vmem:[#allocation7 + $0x60] sm:$0xff]  ;;  %v72_v10 = vld [vmem:[#allocation5 + $0x50] sm:$0xff]  ;;  %s575_s5 = smov 4  }
  0x11   :  { %v91_v9 = vld [vmem:[#allocation7 + $0x68] sm:$0xff]  ;;  %v106_v11 = vadd.f32 %v90_v8, %v74_v5  ;;  %v73_v13 = vld [vmem:[#allocation5 + $0x58] sm:$0xff]  ;;  %v88_v14 = vld [vmem:[#allocation7 + $0x50] sm:$0xff] }
  0x12   :  { %v107_v12 = vadd.f32 %v91_v9, %v75_v6  ;;  %v89_v15 = vld [vmem:[#allocation7 + $0x58] sm:$0xff]  ;;  %v165_v16 = vpack.c.bf16 %v109_v7, %v108_v4  ;;  %v104_v18 = vadd.f32 %v88_v14, %v72_v10  ;;  %v70_v20 = vld [vmem:[#allocation5 + $0x40] sm:$0xff]  ;;  %v71_v21 = vld [vmem:[#allocation5 + $0x48] sm:$0xff] }
  0x13   :  { %v105_v19 = vadd.f32 %v89_v15, %v73_v13  ;;  %v86_v22 = vld [vmem:[#allocation7 + $0x40] sm:$0xff]  ;;  %v87_v23 = vld [vmem:[#allocation7 + $0x48] sm:$0xff]  ;;  %v68_v27 = vld [vmem:[#allocation5 + $0x30] sm:$0xff] }
  0x14   :  { %166 = vmatpush.bf16.msra.mxu0 %v165_v16  ;;  %434 = vmatpush.bf16.msra.mxu1 %v165_v16  ;;  %v164_v17 = vpack.c.bf16 %v107_v12, %v106_v11  ;;  %v102_v25 = vadd.f32 %v86_v22, %v70_v20  ;;  %v103_v26 = vadd.f32 %v87_v23, %v71_v21  ;;  %v69_v28 = vld [vmem:[#allocation5 + $0x38] sm:$0xff]  ;;  %v84_v29 = vld [vmem:[#allocation7 + $0x30] sm:$0xff]  ;;  %v66_v34 = vld [vmem:[#allocation5 + $0x20] sm:$0xff] }
  0x15   :  { %435 = vmatpush.bf16.msra.mxu2 %v165_v16  ;;  %436 = vmatpush.bf16.msra.mxu3 %v165_v16  ;;  %v163_v24 = vpack.c.bf16 %v105_v19, %v104_v18  ;;  %v85_v30 = vld [vmem:[#allocation7 + $0x38] sm:$0xff]  ;;  %v100_v32 = vadd.f32 %v84_v29, %v68_v27  ;;  %v67_v35 = vld [vmem:[#allocation5 + $0x28] sm:$0xff]  ;;  %v82_v36 = vld [vmem:[#allocation7 + $0x20] sm:$0xff] }
  0x16   :  { %v162_v31 = vpack.c.bf16 %v103_v26, %v102_v25  ;;  %v101_v33 = vadd.f32 %v85_v30, %v69_v28  ;;  %v83_v37 = vld [vmem:[#allocation7 + $0x28] sm:$0xff]  ;;  %v98_v39 = vadd.f32 %v82_v36, %v66_v34  ;;  %v64_v41 = vld [vmem:[#allocation5 + $0x10] sm:$0xff]  ;;  %v65_v42 = vld [vmem:[#allocation5 + $0x18] sm:$0xff] }
  0x17   :  { %v99_v40 = vadd.f32 %v83_v37, %v67_v35  ;;  %v80_v43 = vld [vmem:[#allocation7 + $0x10] sm:$0xff]  ;;  %v81_v44 = vld [vmem:[#allocation7 + $0x18] sm:$0xff]  ;;  %v62_v48 = vld [vmem:[#allocation5] sm:$0xff] }
  0x18   :  { %167 = vmatpush.bf16.msra.mxu0 %v164_v17  ;;  %437 = vmatpush.bf16.msra.mxu1 %v164_v17  ;;  %v161_v38 = vpack.c.bf16 %v101_v33, %v100_v32  ;;  %v96_v46 = vadd.f32 %v80_v43, %v64_v41  ;;  %v97_v47 = vadd.f32 %v81_v44, %v65_v42  ;;  %v63_v49 = vld [vmem:[#allocation5 + $0x8] sm:$0xff]  ;;  %v78_v50 = vld [vmem:[#allocation7] sm:$0xff]  ;;  %v112_v4 = vld [vmem:[#allocation2 + $0x10] sm:$0xff] }
  0x19   :  { %438 = vmatpush.bf16.msra.mxu2 %v164_v17  ;;  %439 = vmatpush.bf16.msra.mxu3 %v164_v17  ;;  %v160_v45 = vpack.c.bf16 %v99_v40, %v98_v39  ;;  %v79_v51 = vld [vmem:[#allocation7 + $0x8] sm:$0xff]  ;;  %v94_v53 = vadd.f32 %v78_v50, %v62_v48  ;;  %v110_v55 = vld [vmem:[#allocation2] sm:$0xff]  ;;  %v113_v5 = vld [vmem:[#allocation2 + $0x18] sm:$0xff] }
  0x1a   :  { %v159_v52 = vpack.c.bf16 %v97_v47, %v96_v46  ;;  %v95_v54 = vadd.f32 %v79_v51, %v63_v49  ;;  %v111_v56 = vld [vmem:[#allocation2 + $0x8] sm:$0xff]  ;;  %v118_v58 = vld [vmem:[#allocation2 + $0x40] sm:$0xff]  ;;  %v120_v6 = vld [vmem:[#allocation2 + $0x50] sm:$0xff]  ;;  %v143_v12 = vpack.c.bf16 %v113_v5, %v112_v4 }
  0x1b   :  { %v119_v59 = vld [vmem:[#allocation2 + $0x48] sm:$0xff]  ;;  %v126_v60 = vld [vmem:[#allocation2 + $0x80] sm:$0xff]  ;;  %v142_v0 = vpack.c.bf16 %v111_v56, %v110_v55  ;;  %v121_v7 = vld [vmem:[#allocation2 + $0x58] sm:$0xff] }
  0x1c   :  { %168 = vmatpush.bf16.msra.mxu0 %v163_v24  ;;  %440 = vmatpush.bf16.msra.mxu1 %v163_v24  ;;  %v158_v57 = vpack.c.bf16 %v95_v54, %v94_v53  ;;  %v127_v61 = vld [vmem:[#allocation2 + $0x88] sm:$0xff]  ;;  %v134_v62 = vld [vmem:[#allocation2 + $0xc0] sm:$0xff]  ;;  %v146_v1 = vpack.c.bf16 %v119_v59, %v118_v58  ;;  %v128_v8 = vld [vmem:[#allocation2 + $0x90] sm:$0xff]  ;;  %v147_v13 = vpack.c.bf16 %v121_v7, %v120_v6 }
  0x1d   :  { %441 = vmatpush.bf16.msra.mxu2 %v163_v24  ;;  %442 = vmatpush.bf16.msra.mxu3 %v163_v24  ;;  %v135_v63 = vld [vmem:[#allocation2 + $0xc8] sm:$0xff]  ;;  %v150_v2 = vpack.c.bf16 %v127_v61, %v126_v60  ;;  %v129_v9 = vld [vmem:[#allocation2 + $0x98] sm:$0xff]  ;;  %v136_v10 = vld [vmem:[#allocation2 + $0xd0] sm:$0xff] }
  0x1e   :  { %v154_v3 = vpack.c.bf16 %v135_v63, %v134_v62  ;;  %v137_v11 = vld [vmem:[#allocation2 + $0xd8] sm:$0xff]  ;;  %v151_v14 = vpack.c.bf16 %v129_v9, %v128_v8  ;;  %v114_v16 = vld [vmem:[#allocation2 + $0x20] sm:$0xff]  ;;  %v115_v17 = vld [vmem:[#allocation2 + $0x28] sm:$0xff] }
  0x1f   :  { %v155_v15 = vpack.c.bf16 %v137_v11, %v136_v10  ;;  %v122_v18 = vld [vmem:[#allocation2 + $0x60] sm:$0xff]  ;;  %v123_v19 = vld [vmem:[#allocation2 + $0x68] sm:$0xff]  ;;  %v144_v24 = vpack.c.bf16 %v115_v17, %v114_v16  ;;  %v116_v28 = vld [vmem:[#allocation2 + $0x30] sm:$0xff] }
  0x20   :  { %169 = vmatpush.bf16.msra.mxu0 %v162_v31  ;;  %443 = vmatpush.bf16.msra.mxu1 %v162_v31  ;;  %v130_v20 = vld [vmem:[#allocation2 + $0xa0] sm:$0xff]  ;;  %v131_v21 = vld [vmem:[#allocation2 + $0xa8] sm:$0xff]  ;;  %v148_v25 = vpack.c.bf16 %v123_v19, %v122_v18  ;;  %v117_v29 = vld [vmem:[#allocation2 + $0x38] sm:$0xff] }
  0x21   :  { %444 = vmatpush.bf16.msra.mxu2 %v162_v31  ;;  %445 = vmatpush.bf16.msra.mxu3 %v162_v31  ;;  %v138_v22 = vld [vmem:[#allocation2 + $0xe0] sm:$0xff]  ;;  %v139_v23 = vld [vmem:[#allocation2 + $0xe8] sm:$0xff]  ;;  %v152_v26 = vpack.c.bf16 %v131_v21, %v130_v20  ;;  %v124_v30 = vld [vmem:[#allocation2 + $0x70] sm:$0xff]  ;;  %v145_v36 = vpack.c.bf16 %v117_v29, %v116_v28 }
  0x22   :  { %v156_v27 = vpack.c.bf16 %v139_v23, %v138_v22  ;;  %v125_v31 = vld [vmem:[#allocation2 + $0x78] sm:$0xff]  ;;  %v132_v32 = vld [vmem:[#allocation2 + $0xb0] sm:$0xff] }
  0x23   :  { %v133_v33 = vld [vmem:[#allocation2 + $0xb8] sm:$0xff]  ;;  %v140_v34 = vld [vmem:[#allocation2 + $0xf0] sm:$0xff]  ;;  %v149_v37 = vpack.c.bf16 %v125_v31, %v124_v30 }
  0x24   :  { %170 = vmatpush.bf16.msra.mxu0 %v161_v38  ;;  %446 = vmatpush.bf16.msra.mxu1 %v161_v38  ;;  %v141_v35 = vld [vmem:[#allocation2 + $0xf8] sm:$0xff] }
  0x25   :  { %447 = vmatpush.bf16.msra.mxu2 %v161_v38  ;;  %448 = vmatpush.bf16.msra.mxu3 %v161_v38  ;;  %v153_v38 = vpack.c.bf16 %v133_v33, %v132_v32  ;;  %v157_v39 = vpack.c.bf16 %v141_v35, %v140_v34 }
  0x28   :  { %171 = vmatpush.bf16.msra.mxu0 %v160_v45  ;;  %449 = vmatpush.bf16.msra.mxu1 %v160_v45 }
  0x29   :  { %450 = vmatpush.bf16.msra.mxu2 %v160_v45  ;;  %451 = vmatpush.bf16.msra.mxu3 %v160_v45 }
  0x2c   :  { %172 = vmatpush.bf16.msra.mxu0 %v159_v52  ;;  %452 = vmatpush.bf16.msra.mxu1 %v159_v52 }
  0x2d   :  { %453 = vmatpush.bf16.msra.mxu2 %v159_v52  ;;  %454 = vmatpush.bf16.msra.mxu3 %v159_v52 }
  0x30   :  { %173 = vmatpush.bf16.msra.mxu0 %v158_v57  ;;  %455 = vmatpush.bf16.msra.mxu1 %v158_v57 }
  0x31   :  { %456 = vmatpush.bf16.msra.mxu2 %v158_v57  ;;  %457 = vmatpush.bf16.msra.mxu3 %v158_v57 }
  0x33   :  { %174 = vmatmul.bf16.vlgmr.msra.gmra.mxu0 %v142_v0  ;;  %194 = vmatmul.bf16.vlgmr.msra.gmra.mxu1 %v146_v1 }
  0x34   :  { %214 = vmatmul.bf16.vlgmr.msra.gmra.mxu2 %v150_v2  ;;  %234 = vmatmul.bf16.vlgmr.msra.gmra.mxu3 %v154_v3 }
  0x43   :  { %179 = vmatmul.bf16.gmra.mxu0 %v143_v12  ;;  %199 = vmatmul.bf16.gmra.mxu1 %v147_v13 }
  0x44   :  { %219 = vmatmul.bf16.gmra.mxu2 %v151_v14  ;;  %239 = vmatmul.bf16.gmra.mxu3 %v155_v15 }
  0x53   :  { %184 = vmatmul.bf16.gmra.mxu0 %v144_v24  ;;  %204 = vmatmul.bf16.gmra.mxu1 %v148_v25 }
  0x54   :  { %224 = vmatmul.bf16.gmra.mxu2 %v152_v26  ;;  %244 = vmatmul.bf16.gmra.mxu3 %v156_v27 }
  0x63   :  { %189 = vmatmul.bf16.gmra.mxu0 %v145_v36  ;;  %209 = vmatmul.bf16.gmra.mxu1 %v149_v37 }
  0x64   :  { %229 = vmatmul.bf16.gmra.mxu2 %v153_v38  ;;  %249 = vmatmul.bf16.gmra.mxu3 %v157_v39 }
  0xb0   :  { %v175_v40 = vpop.f32.mrf.mxu0  ;;  %v195_v41 = vpop.f32.mrf.mxu1 }
  0xb7   :  { %v215_v42 = vpop.f32.mrf.mxu2  ;;  %v235_v43 = vpop.f32.mrf.mxu3 }
  0xb8   :  { %v177_v44 = vpop.f32.mrf.mxu0  ;;  %v197_v45 = vpop.f32.mrf.mxu1 }
  0xb9   :  { %v342_v46 = vpack.c.bf16 %v177_v44, %v175_v40  ;;  %v362_v47 = vpack.c.bf16 %v197_v45, %v195_v41 }
  0xbb   :  { %343 = vst [vmem:[#allocation8] sm:$0xff] %v342_v46  }
  0xbc   :  { %422 = vst [vmem:[#allocation8 + $0x20] sm:$0xff] %v362_v47  }
  0xbf   :  { %v217_v48 = vpop.f32.mrf.mxu2  ;;  %v237_v49 = vpop.f32.mrf.mxu3 }
  0xc0   :  { %v382_v50 = vpack.c.bf16 %v217_v48, %v215_v42  ;;  %v402_v51 = vpack.c.bf16 %v237_v49, %v235_v43  ;;  %v180_v52 = vpop.f32.mrf.mxu0  ;;  %v200_v53 = vpop.f32.mrf.mxu1 }
  0xc2   :  { %426 = vst [vmem:[#allocation8 + $0x40] sm:$0xff] %v382_v50  }
  0xc3   :  { %430 = vst [vmem:[#allocation8 + $0x60] sm:$0xff] %v402_v51  }
  0xc7   :  { %v220_v54 = vpop.f32.mrf.mxu2  ;;  %v240_v55 = vpop.f32.mrf.mxu3 }
  0xc8   :  { %v182_v56 = vpop.f32.mrf.mxu0  ;;  %v202_v57 = vpop.f32.mrf.mxu1 }
  0xc9   :  { %v347_v58 = vpack.c.bf16 %v182_v56, %v180_v52  ;;  %v367_v59 = vpack.c.bf16 %v202_v57, %v200_v53 }
  0xcb   :  { %419 = vst [vmem:[#allocation8 + $0x8] sm:$0xff] %v347_v58  }
  0xcc   :  { %423 = vst [vmem:[#allocation8 + $0x28] sm:$0xff] %v367_v59  }
  0xcf   :  { %v222_v60 = vpop.f32.mrf.mxu2  ;;  %v242_v61 = vpop.f32.mrf.mxu3 }
  0xd0   :  { %v387_v62 = vpack.c.bf16 %v222_v60, %v220_v54  ;;  %v407_v63 = vpack.c.bf16 %v242_v61, %v240_v55  ;;  %v185_v0 = vpop.f32.mrf.mxu0  ;;  %v205_v1 = vpop.f32.mrf.mxu1 }
  0xd2   :  { %427 = vst [vmem:[#allocation8 + $0x48] sm:$0xff] %v387_v62  }
  0xd3   :  { %431 = vst [vmem:[#allocation8 + $0x68] sm:$0xff] %v407_v63  }
  0xd7   :  { %v225_v2 = vpop.f32.mrf.mxu2  ;;  %v245_v3 = vpop.f32.mrf.mxu3 }
  0xd8   :  { %v187_v4 = vpop.f32.mrf.mxu0  ;;  %v207_v5 = vpop.f32.mrf.mxu1 }
  0xd9   :  { %v352_v6 = vpack.c.bf16 %v187_v4, %v185_v0  ;;  %v372_v7 = vpack.c.bf16 %v207_v5, %v205_v1 }
  0xdb   :  { %420 = vst [vmem:[#allocation8 + $0x10] sm:$0xff] %v352_v6  }
  0xdc   :  { %424 = vst [vmem:[#allocation8 + $0x30] sm:$0xff] %v372_v7  }
  0xdf   :  { %v227_v8 = vpop.f32.mrf.mxu2  ;;  %v247_v9 = vpop.f32.mrf.mxu3 }
  0xe0   :  { %v392_v10 = vpack.c.bf16 %v227_v8, %v225_v2  ;;  %v412_v11 = vpack.c.bf16 %v247_v9, %v245_v3  ;;  %v190_v12 = vpop.f32.mrf.mxu0  ;;  %v210_v13 = vpop.f32.mrf.mxu1 }
  0xe2   :  { %428 = vst [vmem:[#allocation8 + $0x50] sm:$0xff] %v392_v10  }
  0xe3   :  { %432 = vst [vmem:[#allocation8 + $0x70] sm:$0xff] %v412_v11  }
  0xe7   :  { %v230_v14 = vpop.f32.mrf.mxu2  ;;  %v250_v15 = vpop.f32.mrf.mxu3 }
  0xe8   :  { %v192_v16 = vpop.f32.mrf.mxu0  ;;  %v212_v17 = vpop.f32.mrf.mxu1 }
  0xe9   :  { %v357_v18 = vpack.c.bf16 %v192_v16, %v190_v12  ;;  %v377_v19 = vpack.c.bf16 %v212_v17, %v210_v13 }
  0xeb   :  { %421 = vst [vmem:[#allocation8 + $0x18] sm:$0xff] %v357_v18  }
  0xec   :  { %425 = vst [vmem:[#allocation8 + $0x38] sm:$0xff] %v377_v19  }
  0xef   :  { %v232_v20 = vpop.f32.mrf.mxu2  ;;  %v252_v21 = vpop.f32.mrf.mxu3 }
  0xf0   :  { %v397_v22 = vpack.c.bf16 %v232_v20, %v230_v14  ;;  %v417_v23 = vpack.c.bf16 %v252_v21, %v250_v15 }
  0xf2   :  { %429 = vst [vmem:[#allocation8 + $0x58] sm:$0xff] %v397_v22  }
  0xf3   :  { %433 = vst [vmem:[#allocation8 + $0x78] sm:$0xff] %v417_v23  }
  0xf4   :  { %331 = dma.vmem_to_hbm [thread:$0]  %s324_s2, 2048, %s326_s30, [#allocation4], %s574_s4, %s574_s4, %s575_s5  }
  0xf5   :  { %566 = dma.done.wait [#allocation4], 2048  }
  0xf6   :  { %567 = vsyncadd [#allocation4], 4294965248 }
  0xf7   :  { %336 = vsyncpa [#allocation3], 1 }
  0xf8   :  { %337 = vsyncpa [#allocation6], 1 }
  0xf9   :  { %338 = vsyncpa [#allocation4], 1 }

</bundles_post_ra>
